<compile_context>
chip_gen: v6e
topology: v6e:2x2x1
jax: 0.10.0
libtpu: 0.0.40
codegen_flags: <defaults>
</compile_context>

<pallas_src>
import functools

import jax
import jax.numpy as jnp
from jax.experimental import pallas as pl
from jax.experimental.pallas import tpu as pltpu


def _elu_plus_one(x):
    # torch.nn.functional.elu(x) + 1  ==  x + 1 (x > 0), exp(x) (x <= 0)
    return jnp.where(x > 0, x + 1.0, jnp.exp(x))


def linear_attention_kernel(q_ref, k_ref, v_ref, o_ref, *, eps, v_length):
    # q_ref: (G, L, D)  k_ref: (G, S, D)  v_ref: (G, S, E)  o_ref: (G, L, E)
    q = q_ref[...].astype(jnp.float32)
    k = k_ref[...].astype(jnp.float32)
    v = v_ref[...].astype(jnp.float32)

    Q = _elu_plus_one(q)
    K = _elu_plus_one(k)

    inv_len = 1.0 / float(v_length)
    v_scaled = v * inv_len  # values / v_length

    # KV[g, d, e] = sum_s K[g, s, d] * V[g, s, e]   (MXU, f32 accumulate)
    kv = jnp.einsum('gsd,gse->gde', K, v_scaled,
                    preferred_element_type=jnp.float32)

    # K summed over the key sequence axis: (G, D)
    k_sum = jnp.sum(K, axis=1)

    # Z[g, l, 1] = 1 / (sum_d Q[g, l, d] * k_sum[g, d] + eps)
    denom = jnp.sum(Q * k_sum[:, None, :], axis=-1, keepdims=True) + eps
    z = 1.0 / denom  # (G, L, 1)

    # out[g, l, e] = (Q @ KV) * Z * v_length        (MXU, f32 accumulate)
    out = jnp.einsum('gld,gde->gle', Q, kv,
                     preferred_element_type=jnp.float32)
    out = out * (z * float(v_length))

    o_ref[...] = out.astype(o_ref.dtype)


def linear_attention(queries, keys, values, *, eps=1e-6, bh_tile=8):
    """queries: (N, L, H, D); keys: (N, S, H, D); values: (N, S, H, E).

    Returns (N, L, H*E) — the head-merged 'b n (h d)' output.
    """
    N, L, H, D = queries.shape
    _, S, _, _ = keys.shape
    E = values.shape[-1]
    out_dtype = queries.dtype

    # Layout plumbing stays in the wrapper: fold (batch, head) into one dense
    # leading axis so the kernel sees contiguous (slab, seq, feature) tiles.
    q2 = jnp.transpose(queries, (0, 2, 1, 3)).reshape(N * H, L, D)
    k2 = jnp.transpose(keys, (0, 2, 1, 3)).reshape(N * H, S, D)
    v2 = jnp.transpose(values, (0, 2, 1, 3)).reshape(N * H, S, E)

    BH = N * H
    bh_tile = max(1, min(bh_tile, BH))
    n_blocks = pl.cdiv(BH, bh_tile)
    pad = n_blocks * bh_tile - BH
    if pad:
        q2 = jnp.pad(q2, ((0, pad), (0, 0), (0, 0)))
        k2 = jnp.pad(k2, ((0, pad), (0, 0), (0, 0)))
        v2 = jnp.pad(v2, ((0, pad), (0, 0), (0, 0)))

    total = BH + pad
    flops_per_slab = 2 * S * D * E + 2 * L * D * E + 2 * L * D + 3 * L * E
    cost = pl.CostEstimate(
        flops=total * flops_per_slab,
        transcendentals=total * (L * D + S * D),
        bytes_accessed=4 * total * (L * D + S * D + S * E + L * E),
    )

    kernel = functools.partial(linear_attention_kernel, eps=eps, v_length=S)

    out2 = pl.pallas_call(
        kernel,
        out_shape=jax.ShapeDtypeStruct((total, L, E), out_dtype),
        grid_spec=pltpu.PrefetchScalarGridSpec(
            num_scalar_prefetch=0,
            grid=(n_blocks,),
            in_specs=[
                pl.BlockSpec((bh_tile, L, D), lambda g: (g, 0, 0)),  # queries
                pl.BlockSpec((bh_tile, S, D), lambda g: (g, 0, 0)),  # keys
                pl.BlockSpec((bh_tile, S, E), lambda g: (g, 0, 0)),  # values
            ],
            out_specs=pl.BlockSpec((bh_tile, L, E), lambda g: (g, 0, 0)),
        ),
        compiler_params=pltpu.CompilerParams(
            dimension_semantics=("parallel",)),
        cost_estimate=cost,
    )(q2, k2, v2)

    out2 = out2[:BH]
    # (N*H, L, E) -> (N, L, H*E)
    return out2.reshape(N, H, L, E).transpose(0, 2, 1, 3).reshape(N, L, H * E)


def reference(queries, keys, values, eps=1e-6):
    Q = _elu_plus_one(queries.astype(jnp.float32))
    K = _elu_plus_one(keys.astype(jnp.float32))
    v_length = values.shape[1]
    v = values.astype(jnp.float32) / v_length
    KV = jnp.einsum('nshd,nshv->nhdv', K, v)
    Z = 1.0 / (jnp.einsum('nlhd,nhd->nlh', Q, K.sum(axis=1)) + eps)
    out = jnp.einsum('nlhd,nhdv,nlh->nlhv', Q, KV, Z) * v_length
    n, l, h, e = out.shape
    return out.reshape(n, l, h * e).astype(queries.dtype)


if __name__ == "__main__":
    # Small deterministic shapes: batch=2, q-len=8, kv-len=8, heads=2,
    # head-dim=16 (hidden = heads * head_dim = 32).
    N, L, S, H, D, E = 2, 8, 8, 2, 16, 16
    key = jax.random.PRNGKey(0)
    kq, kk, kv = jax.random.split(key, 3)

    queries = jax.random.normal(kq, (N, L, H, D), dtype=jnp.float32)
    keys = jax.random.normal(kk, (N, S, H, D), dtype=jnp.float32)
    values = jax.random.normal(kv, (N, S, H, E), dtype=jnp.float32)

    out = linear_attention(queries, keys, values)
    out = jax.block_until_ready(out)

    ref = reference(queries, keys, values)
    assert out.shape == (N, L, H * E)
    assert jnp.allclose(out, ref, atol=1e-4, rtol=1e-4), "mismatch vs reference"

    print("KERNEL_OK")
</pallas_src>

<mosaic_0001>
module attributes {stable_mosaic.version = 11 : i64} {
  func.func @linear_attention_kernel(%arg0: i32, %arg1: memref<4x8x16xf32, #tpu.memory_space<vmem>>, %arg2: memref<4x8x16xf32, #tpu.memory_space<vmem>>, %arg3: memref<4x8x16xf32, #tpu.memory_space<vmem>>, %arg4: memref<4x8x16xf32, #tpu.memory_space<vmem>>) attributes {dimension_semantics = [#tpu.dimension_semantics<parallel>], iteration_bounds = array<i64: 1>, scalar_prefetch = 0 : i64, scratch_operands = 0 : i64, tpu.core_type = #tpu.core_type<tc>, window_params = [{transform_indices = @transform_0, window_bounds = array<i64: 4, 8, 16>}, {transform_indices = @transform_1, window_bounds = array<i64: 4, 8, 16>}, {transform_indices = @transform_2, window_bounds = array<i64: 4, 8, 16>}, {transform_indices = @transform_3, window_bounds = array<i64: 4, 8, 16>}]} {
    %c0 = arith.constant 0 : index
    %c0_0 = arith.constant 0 : index
    %c0_1 = arith.constant 0 : index
    %0 = vector.load %arg1[%c0, %c0_0, %c0_1] : memref<4x8x16xf32, #tpu.memory_space<vmem>>, vector<4x8x16xf32>
    %c0_2 = arith.constant 0 : index
    %c0_3 = arith.constant 0 : index
    %c0_4 = arith.constant 0 : index
    %1 = vector.load %arg2[%c0_2, %c0_3, %c0_4] : memref<4x8x16xf32, #tpu.memory_space<vmem>>, vector<4x8x16xf32>
    %c0_5 = arith.constant 0 : index
    %c0_6 = arith.constant 0 : index
    %c0_7 = arith.constant 0 : index
    %2 = vector.load %arg3[%c0_5, %c0_6, %c0_7] : memref<4x8x16xf32, #tpu.memory_space<vmem>>, vector<4x8x16xf32>
    %cst = arith.constant 0.000000e+00 : f32
    %3 = vector.broadcast %cst : f32 to vector<4x8x16xf32>
    %4 = arith.cmpf ogt, %0, %3 : vector<4x8x16xf32>
    %cst_8 = arith.constant 1.000000e+00 : f32
    %5 = vector.broadcast %cst_8 : f32 to vector<4x8x16xf32>
    %6 = arith.addf %0, %5 : vector<4x8x16xf32>
    %7 = math.exp %0 : vector<4x8x16xf32>
    %8 = arith.select %4, %6, %7 : vector<4x8x16xi1>, vector<4x8x16xf32>
    %cst_9 = arith.constant 0.000000e+00 : f32
    %9 = vector.broadcast %cst_9 : f32 to vector<4x8x16xf32>
    %10 = arith.cmpf ogt, %1, %9 : vector<4x8x16xf32>
    %cst_10 = arith.constant 1.000000e+00 : f32
    %11 = vector.broadcast %cst_10 : f32 to vector<4x8x16xf32>
    %12 = arith.addf %1, %11 : vector<4x8x16xf32>
    %13 = math.exp %1 : vector<4x8x16xf32>
    %14 = arith.select %10, %12, %13 : vector<4x8x16xi1>, vector<4x8x16xf32>
    %cst_11 = arith.constant 1.250000e-01 : f32
    %15 = vector.broadcast %cst_11 : f32 to vector<4x8x16xf32>
    %16 = arith.mulf %2, %15 : vector<4x8x16xf32>
    "tpu.trace_start"() <{level = 10 : i32, message = "gsd,gse->gde"}> : () -> ()
    %cst_12 = arith.constant dense<0.000000e+00> : vector<4x16x16xf32>
    %17 = tpu.matmul %14, %16, %cst_12 {dimension_numbers = #tpu.dot_dimension_numbers<[1], [1], [2], [2], [0, 0, 0, 2, 1, 2], [0], [0]>} : vector<4x8x16xf32>, vector<4x8x16xf32>, vector<4x16x16xf32> -> vector<4x16x16xf32>
    "tpu.trace_stop"() : () -> ()
    %cst_13 = arith.constant dense<0.000000e+00> : vector<4x16xf32>
    %18 = vector.multi_reduction <add>, %14, %cst_13 [1] : vector<4x8x16xf32> to vector<4x16xf32>
    %19 = vector.shape_cast %18 : vector<4x16xf32> to vector<4x1x16xf32>
    %20 = vector.broadcast %19 : vector<4x1x16xf32> to vector<4x8x16xf32>
    %21 = arith.mulf %8, %20 : vector<4x8x16xf32>
    %cst_14 = arith.constant dense<0.000000e+00> : vector<4x8xf32>
    %22 = vector.multi_reduction <add>, %21, %cst_14 [2] : vector<4x8x16xf32> to vector<4x8xf32>
    %23 = vector.shape_cast %22 : vector<4x8xf32> to vector<4x8x1xf32>
    %cst_15 = arith.constant 9.99999997E-7 : f32
    %24 = vector.broadcast %cst_15 : f32 to vector<4x8x1xf32>
    %25 = arith.addf %23, %24 : vector<4x8x1xf32>
    %cst_16 = arith.constant 1.000000e+00 : f32
    %26 = vector.broadcast %cst_16 : f32 to vector<4x8x1xf32>
    %27 = arith.divf %26, %25 : vector<4x8x1xf32>
    "tpu.trace_start"() <{level = 10 : i32, message = "gld,gde->gle"}> : () -> ()
    %cst_17 = arith.constant dense<0.000000e+00> : vector<4x8x16xf32>
    %28 = tpu.matmul %8, %17, %cst_17 {dimension_numbers = #tpu.dot_dimension_numbers<[2], [1], [1], [2], [0, 0, 0, 1, 1, 2], [0], [0]>} : vector<4x8x16xf32>, vector<4x16x16xf32>, vector<4x8x16xf32> -> vector<4x8x16xf32>
    "tpu.trace_stop"() : () -> ()
    %cst_18 = arith.constant 8.000000e+00 : f32
    %29 = vector.broadcast %cst_18 : f32 to vector<4x8x1xf32>
    %30 = arith.mulf %27, %29 : vector<4x8x1xf32>
    %31 = vector.broadcast %30 : vector<4x8x1xf32> to vector<4x8x16xf32>
    %32 = arith.mulf %28, %31 : vector<4x8x16xf32>
    %c0_19 = arith.constant 0 : index
    %c0_20 = arith.constant 0 : index
    %c0_21 = arith.constant 0 : index
    %33 = vector.load %arg4[%c0_19, %c0_20, %c0_21] : memref<4x8x16xf32, #tpu.memory_space<vmem>>, vector<4x8x16xf32>
    tpu.vector_store %arg4[%c0_19, %c0_20, %c0_21], %32 {strides = array<i32>} : memref<4x8x16xf32, #tpu.memory_space<vmem>>, vector<4x8x16xf32>,
    return
  }
  func.func @transform_0(%arg0: i32) -> (i32, i32, i32) {
    %c0_i32 = arith.constant 0 : i32
    %c0_i32_0 = arith.constant 0 : i32
    %c0_i32_1 = arith.constant 0 : i32
    return %arg0, %c0_i32, %c0_i32_0 : i32, i32, i32
  }
  func.func @transform_1(%arg0: i32) -> (i32, i32, i32) {
    %c0_i32 = arith.constant 0 : i32
    %c0_i32_0 = arith.constant 0 : i32
    %c0_i32_1 = arith.constant 0 : i32
    return %arg0, %c0_i32, %c0_i32_0 : i32, i32, i32
  }
  func.func @transform_2(%arg0: i32) -> (i32, i32, i32) {
    %c0_i32 = arith.constant 0 : i32
    %c0_i32_0 = arith.constant 0 : i32
    %c0_i32_1 = arith.constant 0 : i32
    return %arg0, %c0_i32, %c0_i32_0 : i32, i32, i32
  }
  func.func @transform_3(%arg0: i32) -> (i32, i32, i32) {
    %c0_i32 = arith.constant 0 : i32
    %c0_i32_0 = arith.constant 0 : i32
    %c0_i32_1 = arith.constant 0 : i32
    return %arg0, %c0_i32, %c0_i32_0 : i32, i32, i32
  }
}

</mosaic_0001>

<bundles_post_ra>
// kernel: tpu_custom_call.1
= control target key start
LH: loop header
LB: loop body
LE: loop exit
PB: predicated region body
PF: predicated region fallthrough
CT: control target
= control target key end

     0   :  { %8 = vsyncpa [#allocation3], 0  ;;  %s1238_s0 = inlined_call_operand.hbm [shape: f32[4,8,16], index: 0, kind: input, shape index: {}]   ;;  %s1239_s1 = inlined_call_operand.hbm [shape: f32[4,8,16], index: 1, kind: input, shape index: {}]   ;;  %s1240_s2 = inlined_call_operand.hbm [shape: f32[4,8,16], index: 2, kind: input, shape index: {}]   ;;  %s1241_s3 = inlined_call_operand.hbm [shape: f32[4,8,16], index: 3, kind: output, shape index: {}]  }
   0x1   :  { %9 = vsyncpa [#allocation6], 0 }
   0x2   :  { %10 = vsyncpa [#allocation4], 0  ;;  %s1146_s12 = smov [#allocation5]   ;;  %s1147_s14 = smov [#allocation2]  }
   0x3   :  { %s28_s13 = sshll.u32 %s1146_s12, 4  ;;  %s16_s15 = sshll.u32 %s1147_s14, 4  ;;  %s29_s13 = int_to_ptr.vmem [resolvable:$true] %s28_s13  ;;  %s17_s15 = int_to_ptr.vmem [resolvable:$true] %s16_s15 }
   0x4   :  { %s1068_s16 = scalar_lea.vmem %s29_s13, 512  ;;  %p1073_p1 = scmp.lt.s32.totalorder %s29_s13, %s29_s13 }
   0x5   :  { %p1069_p0 = scmp.ne.s32.totalorder %s29_s13, %s1068_s16  ;;  %p1074_p2 = scmp.lt.s32.totalorder %s1068_s16, %s1068_s16 }
   0x7   :  { %p1075_p3 = por %p1074_p2, %p1073_p1 }
   0x9   :  { %p1076_p4 = pnand %p1075_p3, %p1069_p0 }
   0xb   :  { %1079 = shalt.err (!%p1076_p4)
}
   0xc   :  { %s1148_s17 = smov 128   ;;  %s1149_s18 = smov 8  }
   0xd   :  { %34 = dma.hbm_to_vmem [thread:$0]  %s1239_s1, 512, %s29_s13, [#allocation6], %s1148_s17, %s1148_s17, %s1149_s18  }
   0xe   :  { %s1088_s21 = scalar_lea.vmem %s17_s15, 512  ;;  %p1093_p6 = scmp.lt.s32.totalorder %s17_s15, %s17_s15 }
   0xf   :  { %p1089_p5 = scmp.ne.s32.totalorder %s17_s15, %s1088_s21  ;;  %p1094_p7 = scmp.lt.s32.totalorder %s1088_s21, %s1088_s21 }
  0x11   :  { %p1095_p8 = por %p1094_p7, %p1093_p6 }
  0x13   :  { %p1096_p9 = pnand %p1095_p8, %p1089_p5 }
  0x15   :  { %1099 = shalt.err (!%p1096_p9)
}
  0x16   :  { %22 = dma.hbm_to_vmem [thread:$0]  %s1238_s0, 512, %s17_s15, [#allocation3], %s1148_s17, %s1148_s17, %s1149_s18  }
  0x17   :  { %s1150_s24 = smov [#allocation7]  }
  0x18   :  { %s40_s25 = sshll.u32 %s1150_s24, 4  ;;  %s41_s25 = int_to_ptr.vmem [resolvable:$true] %s40_s25 }
  0x19   :  { %s1108_s26 = scalar_lea.vmem %s41_s25, 512  ;;  %p1113_p11 = scmp.lt.s32.totalorder %s41_s25, %s41_s25 }
  0x1a   :  { %p1109_p10 = scmp.ne.s32.totalorder %s41_s25, %s1108_s26  ;;  %p1114_p12 = scmp.lt.s32.totalorder %s1108_s26, %s1108_s26 }
  0x1c   :  { %p1115_p13 = por %p1114_p12, %p1113_p11 }
  0x1e   :  { %p1116_p0 = pnand %p1115_p13, %p1109_p10 }
  0x20   :  { %1119 = shalt.err (!%p1116_p0)
}
  0x21   :  { %46 = dma.hbm_to_vmem [thread:$0]  %s1240_s2, 512, %s41_s25, [#allocation6], %s1148_s17, %s1148_s17, %s1149_s18  }
  0x22   :  { %1140 = dma.done.wait [#allocation3], 512  }
  0x23   :  { %1141 = vsyncadd [#allocation3], 4294966784 }
  0x24   :  { %1142 = dma.done.wait [#allocation6], 1024  }
  0x25   :  { %1143 = vsyncadd [#allocation6], 4294966272  ;;  %v60_v0 = vld [vmem:[#allocation5] sm:$0xff]  ;;  %v62_v1 = vld [vmem:[#allocation5 + $0x10] sm:$0xff]  ;;  %vm144_vm4 = vcmask 64512   ;;  %vm565_vm5 = vcmask 130048  }
  0x26   :  { %v61_v2 = vld [vmem:[#allocation5 + $0x8] sm:$0xff]  ;;  %v96_v3 = vmul.f32 1.442695, %v60_v0  ;;  %v63_v4 = vld [vmem:[#allocation5 + $0x18] sm:$0xff]  ;;  %v100_v5 = vmul.f32 1.442695, %v62_v1 }
  0x27   :  { %v98_v6 = vmul.f32 1.442695, %v61_v2  ;;  %v102_v7 = vmul.f32 1.442695, %v63_v4  ;;  %v92_v8 = vadd.f32 1.0, %v60_v0  ;;  %vm88_vm0 = vcmp.gt.f32.partialorder %v60_v0, 0.0 }
  0x28   :  { %1036 = vpow2.f32 %v96_v3  ;;  %v94_v9 = vadd.f32 1.0, %v62_v1  ;;  %v64_v10 = vld [vmem:[#allocation7] sm:$0xff]  ;;  %vm90_vm1 = vcmp.gt.f32.partialorder %v62_v1, 0.0  ;;  %v93_v13 = vadd.f32 1.0, %v61_v2  ;;  %v66_v19 = vld [vmem:[#allocation7 + $0x10] sm:$0xff]  ;;  %v65_v24 = vld [vmem:[#allocation7 + $0x8] sm:$0xff] }
  0x29   :  { %1038 = vpow2.f32 %v100_v5  ;;  %v108_v11 = vmul.f32 0.125, %v64_v10  ;;  %vm89_vm2 = vcmp.gt.f32.partialorder %v61_v2, 0.0  ;;  %v95_v16 = vadd.f32 1.0, %v63_v4  ;;  %v67_v26 = vld [vmem:[#allocation7 + $0x18] sm:$0xff]  ;;  %v56_v36 = vld [vmem:[#allocation2] sm:$0xff]  ;;  %v57_v37 = vld [vmem:[#allocation2 + $0x8] sm:$0xff] }
  0x2a   :  { %1040 = vpow2.f32 %v98_v6  ;;  %vm91_vm3 = vcmp.gt.f32.partialorder %v63_v4, 0.0  ;;  %v110_v21 = vmul.f32 0.125, %v66_v19  ;;  %v109_v25 = vmul.f32 0.125, %v65_v24  ;;  %v58_v39 = vld [vmem:[#allocation2 + $0x10] sm:$0xff]  ;;  %v59_v51 = vld [vmem:[#allocation2 + $0x18] sm:$0xff]  ;;  %s1153_s0 = smov [#allocation8]  }
  0x2b   :  { %1042 = vpow2.f32 %v102_v7  ;;  %980 = vmatprep.subr.mxu0 %v108_v11  ;;  %v111_v27 = vmul.f32 0.125, %v67_v26  ;;  %v76_v43 = vmul.f32 1.442695, %v56_v36  ;;  %v78_v44 = vmul.f32 1.442695, %v57_v37  ;;  %s931_s2 = sshll.u32 %s1153_s0, 4  ;;  %s932_s2 = int_to_ptr.vmem [resolvable:$true] %s931_s2 }
  0x2c   :  { %981 = vmatpush3.msra.mxu0 %v108_v11  ;;  %985 = vmatprep.subr.mxu1 %v109_v25  ;;  %v80_v46 = vmul.f32 1.442695, %v58_v39  ;;  %v1151_v50 = vmov 0.0   ;;  %v82_v53 = vmul.f32 1.442695, %v59_v51  ;;  %vm1152_vm6 = vmmov 0   ;;  %p1125_p2 = scmp.lt.s32.totalorder %s932_s2, %s932_s2 }
  0x2d   :  { %990 = vmatprep.subr.mxu0 %v110_v21  ;;  %986 = vmatpush3.msra.mxu1 %v109_v25  ;;  %1044 = vpow2.f32 %v76_v43  ;;  %vm68_vm7 = vcmp.gt.f32.partialorder %v56_v36, 0.0  ;;  %v72_v2 = vadd.f32 1.0, %v56_v36  ;;  %vm69_vm8 = vcmp.gt.f32.partialorder %v57_v37, 0.0  ;;  %s1120_s28 = scalar_lea.vmem %s932_s2, 512 }
  0x2e   :  { %995 = vmatprep.subr.mxu1 %v111_v27  ;;  %1046 = vpow2.f32 %v78_v44  ;;  %v73_v4 = vadd.f32 1.0, %v57_v37  ;;  %vm70_vm9 = vcmp.gt.f32.partialorder %v58_v39, 0.0  ;;  %v74_v5 = vadd.f32 1.0, %v58_v39  ;;  %p1121_p1 = scmp.ne.s32.totalorder %s932_s2, %s1120_s28  ;;  %p1126_p3 = scmp.lt.s32.totalorder %s1120_s28, %s1120_s28 }
  0x2f   :  { %1048 = vpow2.f32 %v80_v46  ;;  %vm71_vm10 = vcmp.gt.f32.partialorder %v59_v51, 0.0 }
  0x30   :  { %1050 = vpow2.f32 %v82_v53  ;;  %p1127_p4 = por %p1126_p3, %p1125_p2 }
  0x32   :  { %p1128_p5 = pnand %p1127_p4, %p1121_p1 }
  0x35   :  { %v1037_v12 = vpop.eup %1036 }
  0x36   :  { %v1039_v14 = vpop.eup %1038  ;;  %v104_v15 = vsel %vm88_vm0, %v92_v8, %v1037_v12 }
  0x37   :  { %v1041_v17 = vpop.eup %1040  ;;  %112 = vxpose.xlu0.b32.start.end [1/1] (short) (narrow) %v104_v15, 16  ;;  %v106_v18 = vsel %vm90_vm1, %v94_v9, %v1039_v14  ;;  %v566_v38 = vsel %vm565_vm5, %v104_v15, 0.0 }
  0x38   :  { %v1043_v20 = vpop.eup %1042  ;;  %339 = vxpose.xlu1.b32.start.end [1/1] (short) (narrow) %v106_v18, 16  ;;  %v105_v22 = vsel %vm89_vm2, %v93_v13, %v1041_v17  ;;  %v580_v40 = vsel %vm565_vm5, %v106_v18, 0.0  ;;  %v567_v45 = vrot.slane %v566_v38, 4  ;;  %v75_v17 = vadd.f32 1.0, %v59_v51 }
  0x39   :  { %v107_v23 = vsel %vm91_vm3, %v95_v16, %v1043_v20  ;;  %v573_v41 = vsel %vm565_vm5, %v105_v22, 0.0  ;;  %v581_v47 = vrot.slane %v580_v40, 4 }
  0x3a   :  { %v587_v42 = vsel %vm565_vm5, %v107_v23, 0.0  ;;  %v574_v48 = vrot.slane %v573_v41, 4  ;;  %v568_v52 = vadd.f32 %v567_v45, %v566_v38  ;;  %v1045_v1 = vpop.eup %1044 }
  0x3b   :  { %v588_v49 = vrot.slane %v587_v42, 4  ;;  %v582_v54 = vadd.f32 %v581_v47, %v580_v40  ;;  %v1047_v3 = vpop.eup %1046  ;;  %v84_v11 = vsel %vm68_vm7, %v72_v2, %v1045_v1 }
  0x3c   :  { %226 = vxpose.xlu0.b32.start.end [1/1] (short) (narrow) %v105_v22, 16  ;;  %v575_v55 = vadd.f32 %v574_v48, %v573_v41  ;;  %v569_v57 = vrot.slane %v568_v52, 2  ;;  %v1049_v6 = vpop.eup %1048  ;;  %v85_v15 = vsel %vm69_vm8, %v73_v4, %v1047_v3 }
  0x3d   :  { %452 = vxpose.xlu1.b32.start.end [1/1] (short) (narrow) %v107_v23, 16  ;;  %v589_v56 = vadd.f32 %v588_v49, %v587_v42  ;;  %v583_v58 = vrot.slane %v582_v54, 2  ;;  %v86_v16 = vsel %vm70_vm9, %v74_v5, %v1049_v6  ;;  %v1051_v18 = vpop.eup %1050 }
  0x3e   :  { %v576_v59 = vrot.slane %v575_v55, 2  ;;  %v570_v61 = vadd.f32 %v569_v57, %v568_v52  ;;  %v87_v25 = vsel %vm71_vm10, %v75_v17, %v1051_v18 }
  0x3f   :  { %v590_v60 = vrot.slane %v589_v56, 2  ;;  %v584_v62 = vadd.f32 %v583_v58, %v582_v54 }
  0x40   :  { %v577_v63 = vadd.f32 %v576_v59, %v575_v55  ;;  %v571_v9 = vrot.slane %v570_v61, 1 }
  0x41   :  { %v591_v0 = vadd.f32 %v590_v60, %v589_v56  ;;  %v585_v8 = vrot.slane %v584_v62, 1 }
  0x42   :  { %v578_v7 = vrot.slane %v577_v63, 1  ;;  %v572_v14 = vadd.f32 %v571_v9, %v570_v61 }
  0x43   :  { %v592_v10 = vrot.slane %v591_v0, 1  ;;  %v586_v13 = vadd.f32 %v585_v8, %v584_v62 }
  0x44   :  { %v579_v12 = vadd.f32 %v578_v7, %v577_v63 }
  0x45   :  { %v596_v20 = vmul.f32 %v586_v13, %v86_v16  ;;  %v593_v22 = vadd.f32 %v592_v10, %v591_v0 }
  0x46   :  { %v595_v19 = vmul.f32 %v579_v12, %v85_v15 }
  0x47   :  { %v604_v26 = vsel %vm565_vm5, %v596_v20, 0.0 }
  0x48   :  { %v601_v23 = vsel %vm565_vm5, %v595_v19, 0.0 }
  0x68   :  { %602 = vadd.xlane.f32.xlu1 %v601_v23 }
  0x6c   :  { %605 = vadd.xlane.f32.xlu1 %v604_v26 }
  0xb3   :  { %v128_v28 = vpop.trf.xlu0 }
  0xb4   :  { %982 = vmatprep.mubr.msk.f32.mxu0 %vm144_vm4, %v128_v28  ;;  %v355_v29 = vpop.trf.xlu1 }
  0xb7   :  { %v129_v30 = vpop.trf.xlu0 }
  0xb8   :  { %983 = vmatmul.mubr.msk.f32.vlgmr.msra.gmra.mxu0 %vm144_vm4, %v129_v30  ;;  %v356_v31 = vpop.trf.xlu1 }
  0xb9   :  { %992 = vmatprep.mubr.msk.f32.mxu0 %vm144_vm4, %v355_v29  ;;  %991 = vmatpush3.msra.mxu0 %v110_v21  ;;  %v594_v21 = vmul.f32 %v572_v14, %v84_v11 }
  0xba   :  { %1000 = vmatprep.subr.mxu0 %v1151_v50 }
  0xbb   :  { %v242_v32 = vpop.trf.xlu0  ;;  %v598_v24 = vsel %vm565_vm5, %v594_v21, 0.0 }
  0xbc   :  { %987 = vmatprep.mubr.msk.f32.mxu1 %vm144_vm4, %v242_v32  ;;  %993 = vmatmul.mubr.msk.f32.vlgmr.msra.gmra.mxu0 %vm144_vm4, %v356_v31  ;;  %v468_v33 = vpop.trf.xlu1 }
  0xbd   :  { %1004 = vmatprep.mubr.msk.f32.mxu0 %vm1152_vm6, %v1151_v50  ;;  %599 = vadd.xlane.f32.xlu0 %v598_v24 }
  0xbf   :  { %v243_v34 = vpop.trf.xlu0 }
  0xc0   :  { %988 = vmatmul.mubr.msk.f32.vlgmr.msra.gmra.mxu1 %vm144_vm4, %v243_v34  ;;  %v469_v35 = vpop.trf.xlu1 }
  0xc1   :  { %996 = vmatpush3.msra.mxu1 %v111_v27  ;;  %997 = vmatprep.mubr.msk.f32.mxu1 %vm144_vm4, %v468_v33  ;;  %v597_v27 = vmul.f32 %v593_v22, %v87_v25 }
  0xc2   :  { %1007 = vmatprep.subr.mxu1 %v1151_v50 }
  0xc3   :  { %v607_v28 = vsel %vm565_vm5, %v597_v27, 0.0 }
  0xc4   :  { %998 = vmatmul.mubr.msk.f32.vlgmr.msra.gmra.mxu1 %vm144_vm4, %v469_v35  ;;  %608 = vadd.xlane.f32.xlu1 %v607_v28 }
  0xc5   :  { %1011 = vmatprep.mubr.msk.f32.mxu1 %vm1152_vm6, %v1151_v50 }
  0xf1   :  { %v603_v37 = vpop.xlane.xlu1 %602 }
  0xf2   :  { %v611_v43 = vadd.f32 1e-06, %v603_v37 }
  0xf5   :  { %v606_v40 = vpop.xlane.xlu1 %605 }
  0xf6   :  { %v612_v41 = vadd.f32 1e-06, %v606_v40 }
 0x146   :  { %v600_v38 = vpop.xlane.xlu0 %599 }
 0x147   :  { %v610_v39 = vadd.f32 1e-06, %v600_v38 }
 0x149   :  { %1052 = vrcp.f32 %v610_v39 }
 0x14a   :  { %1054 = vrcp.f32 %v612_v41 }
 0x14b   :  { %1056 = vrcp.f32 %v611_v43 }
 0x14d   :  { %v609_v42 = vpop.xlane.xlu1 %608 }
 0x14e   :  { %v613_v44 = vadd.f32 1e-06, %v609_v42 }
 0x150   :  { %1058 = vrcp.f32 %v613_v44 }
 0x156   :  { %v1053_v45 = vpop.eup %1052 }
 0x157   :  { %v914_v46 = vmul.f32 8.0, %v1053_v45  ;;  %v1055_v47 = vpop.eup %1054 }
 0x158   :  { %v1057_v52 = vpop.eup %1056 }
 0x159   :  { %v915_v57 = vmul.f32 8.0, %v1057_v52 }
 0x15d   :  { %v1059_v55 = vpop.eup %1058 }
 0x15e   :  { %v917_v60 = vmul.f32 8.0, %v1059_v55 }
 0x178   :  { %v984_v29 = vpop.f32.mrf.mxu0 }
 0x179   :  { %1001 = vmatpush3.msra.mxu0 %v984_v29 }
 0x17a   :  { %v217_v30 = vpop.f32.mrf.mxu0  ;;  %1002 = vmatprep.subr.mxu0 %v1151_v50 }
 0x17b   :  { %1003 = vmatpush3.msra.mxu0 %v217_v30 }
 0x17c   :  { %v994_v31 = vpop.f32.mrf.mxu0  ;;  %1014 = vmatprep.subr.mxu0 %v1151_v50  ;;  %1005 = vmatmul.mubr.msk.f32.vlgmr.msra.gmra.mxu0 %vm565_vm5, %v84_v11 }
 0x17d   :  { %1015 = vmatpush3.msra.mxu0 %v994_v31  ;;  %1018 = vmatprep.mubr.msk.f32.mxu0 %vm1152_vm6, %v1151_v50 }
 0x17e   :  { %v443_v32 = vpop.f32.mrf.mxu0  ;;  %1016 = vmatprep.subr.mxu0 %v1151_v50 }
 0x17f   :  { %1017 = vmatpush3.msra.mxu0 %v443_v32 }
 0x180   :  { %v989_v33 = vpop.f32.mrf.mxu1  ;;  %1019 = vmatmul.mubr.msk.f32.vlgmr.msra.gmra.mxu0 %vm565_vm5, %v86_v16 }
 0x181   :  { %1008 = vmatpush3.msra.mxu1 %v989_v33 }
 0x182   :  { %v330_v34 = vpop.f32.mrf.mxu1  ;;  %1009 = vmatprep.subr.mxu1 %v1151_v50 }
 0x183   :  { %1010 = vmatpush3.msra.mxu1 %v330_v34 }
 0x184   :  { %v999_v35 = vpop.f32.mrf.mxu1  ;;  %1012 = vmatmul.mubr.msk.f32.vlgmr.msra.gmra.mxu1 %vm565_vm5, %v85_v15  ;;  %1021 = vmatprep.subr.mxu1 %v1151_v50 }
 0x185   :  { %1022 = vmatpush3.msra.mxu1 %v999_v35  ;;  %1025 = vmatprep.mubr.msk.f32.mxu1 %vm1152_vm6, %v1151_v50 }
 0x186   :  { %v556_v36 = vpop.f32.mrf.mxu1  ;;  %1023 = vmatprep.subr.mxu1 %v1151_v50  ;;  %v916_v50 = vmul.f32 8.0, %v1055_v47 }
 0x187   :  { %1024 = vmatpush3.msra.mxu1 %v556_v36 }
 0x188   :  { %1026 = vmatmul.mubr.msk.f32.vlgmr.msra.gmra.mxu1 %vm565_vm5, %v87_v25 }
 0x23c   :  { %v691_v48 = vpop.f32.mrf.mxu0 }
 0x23d   :  { %v918_v49 = vmul.f32 %v914_v46, %v691_v48 }
 0x23e   :  { %v1006_v51 = vpop.f32.mrf.mxu0 }
 0x23f   :  { %922 = vst.msk [vmem:[#allocation8] sm:$0xff] %vm565_vm5, %v918_v49 }
 0x240   :  { %v837_v53 = vpop.f32.mrf.mxu0 }
 0x241   :  { %v920_v54 = vmul.f32 %v916_v50, %v837_v53 }
 0x242   :  { %v1020_v56 = vpop.f32.mrf.mxu0 }
 0x243   :  { %924 = vst.msk [vmem:[#allocation8 + $0x10] sm:$0xff] %vm565_vm5, %v920_v54 }
 0x244   :  { %v764_v58 = vpop.f32.mrf.mxu1 }
 0x245   :  { %v919_v59 = vmul.f32 %v915_v57, %v764_v58 }
 0x246   :  { %v1013_v61 = vpop.f32.mrf.mxu1 }
 0x247   :  { %923 = vst.msk [vmem:[#allocation8 + $0x8] sm:$0xff] %vm565_vm5, %v919_v59 }
 0x248   :  { %v910_v62 = vpop.f32.mrf.mxu1 }
 0x249   :  { %v921_v63 = vmul.f32 %v917_v60, %v910_v62 }
 0x24a   :  { %v1027_v0 = vpop.f32.mrf.mxu1 }
 0x24b   :  { %925 = vst.msk [vmem:[#allocation8 + $0x18] sm:$0xff] %vm565_vm5, %v921_v63 }
 0x24c   :  { %1131 = shalt.err (!%p1128_p5)
}
 0x24d   :  { %937 = dma.vmem_to_hbm [thread:$0]  %s932_s2, 512, %s1241_s3, [#allocation4], %s1148_s17, %s1148_s17, %s1149_s18  }
 0x24e   :  { %1144 = dma.done.wait [#allocation4], 512  }
 0x24f   :  { %1145 = vsyncadd [#allocation4], 4294966784 }
 0x250   :  { %941 = vsyncpa [#allocation3], 1 }
 0x251   :  { %942 = vsyncpa [#allocation6], 1 }
 0x252   :  { %943 = vsyncpa [#allocation4], 1 }

</bundles_post_ra>
